<compile_context>
chip_gen: v6e
topology: v6e:2x2x1
jax: 0.10.0
libtpu: 0.0.40
codegen_flags: <defaults>
</compile_context>

<pallas_src>
import functools
import math

import numpy as np

import jax
import jax.numpy as jnp
from jax.experimental import pallas as pl
from jax.experimental.pallas import tpu as pltpu


# ---------------------------------------------------------------------------
# Host-side construction of the static pooling / upsampling matrices.
# ---------------------------------------------------------------------------
def _adaptive_pool_matrix(bin_size, in_size):
    """(bin_size, in_size) averaging matrix, PyTorch adaptive_avg_pool rules."""
    mat = np.zeros((bin_size, in_size), np.float32)
    for i in range(bin_size):
        start = (i * in_size) // bin_size
        end = -((-(i + 1) * in_size) // bin_size)          # ceil((i+1)*in/bin)
        mat[i, start:end] = 1.0 / (end - start)
    return mat


def _bilinear_matrix(out_size, in_size):
    """(out_size, in_size) bilinear interpolation matrix, align_corners=True."""
    mat = np.zeros((out_size, in_size), np.float32)
    if in_size == 1:
        mat[:, 0] = 1.0
        return mat
    scale = (in_size - 1) / (out_size - 1) if out_size > 1 else 0.0
    for o in range(out_size):
        src = o * scale
        i0 = min(int(math.floor(src)), in_size - 1)
        i1 = min(i0 + 1, in_size - 1)
        frac = src - i0
        mat[o, i0] += 1.0 - frac
        mat[o, i1] += frac
    return mat


def _build_ppm_matrices(H, W, pyramids):
    """Returns (B_hwk, M_hwk, KP) with the pooled-cell axis padded to 128*n."""
    b_blocks, m_blocks = [], []
    for b in pyramids:
        ah = _adaptive_pool_matrix(b, H)       # (b, H)
        aw = _adaptive_pool_matrix(b, W)       # (b, W)
        uh = _bilinear_matrix(H, b)            # (H, b)
        uw = _bilinear_matrix(W, b)            # (W, b)
        # pooled[i*b+j] = sum_{h,w} ah[i,h] * aw[j,w] * x[h,w]
        b_blocks.append(np.kron(ah, aw))       # (b*b, H*W)
        # up[h*W+w]     = sum_{i,j} uh[h,i] * uw[w,j] * pooled[i*b+j]
        m_blocks.append(np.kron(uh, uw))       # (H*W, b*b)
    b_all = np.concatenate(b_blocks, axis=0)   # (Ktot, H*W)
    m_all = np.concatenate(m_blocks, axis=1)   # (H*W, Ktot)
    ktot = b_all.shape[0]
    kp = ((ktot + 127) // 128) * 128           # lane-dense pooled-cell axis
    b_pad = np.zeros((kp, H * W), np.float32)
    b_pad[:ktot] = b_all
    m_pad = np.zeros((H * W, kp), np.float32)
    m_pad[:, :ktot] = m_all
    b_hwk = np.ascontiguousarray(b_pad.T).reshape(H, W, kp)
    m_hwk = m_pad.reshape(H, W, kp)
    return jnp.asarray(b_hwk), jnp.asarray(m_hwk), kp


def _pick_tiles(H, W, C, KP, itemsize, budget_bytes=12 << 20):
    """Largest (tile_h, tile_c) whose double-buffered working set fits budget.

    Budget is conservative so it fits the default scoped-VMEM limit on every
    generation (16 MiB v5e, 32 MiB v6e/v7x) without raising vmem_limit_bytes.
    """
    c_opts = [d for d in range(1, C + 1)
              if C % d == 0 and (d % 128 == 0 or d == C)]
    h_opts = [d for d in range(1, H + 1) if H % d == 0]
    best_th, best_ct, best_elems = h_opts[0], c_opts[0], -1
    for ct in c_opts:
        for th in h_opts:
            step = (2 * th * W * ct * itemsize     # x tile + out tile
                    + th * W * KP * 4              # B / M tile (f32)
                    + KP * ct * 4)                 # pooled tile (f32)
            if 2 * step <= budget_bytes and th * ct > best_elems:
                best_th, best_ct, best_elems = th, ct, th * ct
    return best_th, best_ct


# ---------------------------------------------------------------------------
# Pallas kernels (NHWC, channels on lanes).
# ---------------------------------------------------------------------------
def _ppm_pool_kernel(x_ref, b_ref, p_ref):
    """Accumulate pooled[k, c] += sum_{h,w in row-tile} B[h,w,k] * x[h,w,c]."""
    @pl.when(pl.program_id(2) == 0)
    def _():
        p_ref[...] = jnp.zeros_like(p_ref)

    th, w, ct = x_ref.shape
    kp = b_ref.shape[-1]
    x2 = x_ref[...].reshape(th * w, ct)        # merge leading dims, lane (C) fixed
    b2 = b_ref[...].reshape(th * w, kp)        # merge leading dims, lane (K) fixed
    # (KP, S) @ (S, CT) on the MXU with f32 accumulation.
    p_ref[...] += jnp.dot(b2.T, x2, preferred_element_type=jnp.float32)


def _ppm_upsample_add_kernel(x_ref, m_ref, p_ref, o_ref):
    """out = x + sum_k M[...,k] * pooled[k,:]  (all pyramid levels fused)."""
    th, w, ct = x_ref.shape
    kp = p_ref.shape[0]
    x2 = x_ref[...].reshape(th * w, ct).astype(jnp.float32)
    m2 = m_ref[...].reshape(th * w, kp)
    up = jnp.dot(m2, p_ref[...], preferred_element_type=jnp.float32)
    o_ref[...] = (x2 + up).reshape(th, w, ct).astype(o_ref.dtype)


# ---------------------------------------------------------------------------
# Wrapper (PyTorch-compatible NCHW interface by default).
# ---------------------------------------------------------------------------
@functools.partial(jax.jit,
                   static_argnames=("pyramids", "data_format", "tile_h", "tile_c"))
def pyramid_pooling_module(x, pyramids=(1, 2, 3, 6), data_format="NCHW",
                           tile_h=None, tile_c=None):
    """PyramidPoolingModule forward.  x: (N, C, H, W) like the PyTorch module."""
    if data_format == "NCHW":
        x_nhwc = jnp.transpose(x, (0, 2, 3, 1))
    elif data_format == "NHWC":
        x_nhwc = x
    else:
        raise ValueError(f"unknown data_format: {data_format}")

    N, H, W, C = x_nhwc.shape
    b_hwk, m_hwk, kp = _build_ppm_matrices(H, W, pyramids)

    itemsize = jnp.dtype(x_nhwc.dtype).itemsize
    auto_th, auto_ct = _pick_tiles(H, W, C, kp, itemsize)
    th = auto_th if tile_h is None else tile_h
    ct = auto_ct if tile_c is None else tile_c
    if H % th != 0:
        raise ValueError("tile_h must divide H")
    if C % ct != 0 or not (ct % 128 == 0 or ct == C):
        raise ValueError("tile_c must divide C and be a multiple of 128 (or == C)")
    n_h, n_c = H // th, C // ct
    sq = pl.Squeezed()

    # ---- pass 1: adaptive average pooling of every pyramid level ----------
    pooled = pl.pallas_call(
        _ppm_pool_kernel,
        grid=(N, n_c, n_h),                    # reduction (row tiles) last
        in_specs=[
            pl.BlockSpec((sq, th, W, ct), lambda n, c, t: (n, t, 0, c)),
            pl.BlockSpec((th, W, kp), lambda n, c, t: (t, 0, 0)),
        ],
        out_specs=pl.BlockSpec((sq, kp, ct), lambda n, c, t: (n, 0, c)),
        out_shape=jax.ShapeDtypeStruct((N, kp, C), jnp.float32),
        compiler_params=pltpu.CompilerParams(
            dimension_semantics=("parallel", "parallel", "arbitrary")),
    )(x_nhwc, b_hwk)

    # ---- pass 2: fused bilinear upsample (align_corners) + residual add ---
    out_nhwc = pl.pallas_call(
        _ppm_upsample_add_kernel,
        grid=(N, n_h, n_c),
        in_specs=[
            pl.BlockSpec((sq, th, W, ct), lambda n, t, c: (n, t, 0, c)),
            pl.BlockSpec((th, W, kp), lambda n, t, c: (t, 0, 0)),
            pl.BlockSpec((sq, kp, ct), lambda n, t, c: (n, 0, c)),
        ],
        out_specs=pl.BlockSpec((sq, th, W, ct), lambda n, t, c: (n, t, 0, c)),
        out_shape=jax.ShapeDtypeStruct((N, H, W, C), x_nhwc.dtype),
        compiler_params=pltpu.CompilerParams(
            dimension_semantics=("parallel", "parallel", "parallel")),
    )(x_nhwc, m_hwk, pooled)

    if data_format == "NCHW":
        return jnp.transpose(out_nhwc, (0, 3, 1, 2))
    return out_nhwc


# ---------------------------------------------------------------------------
# Pure-JAX reference (independent path: slice means + gather interpolation).
# ---------------------------------------------------------------------------
def _adaptive_avg_pool2d_ref(x_nchw, bin_size):
    _, _, H, W = x_nchw.shape
    rows = []
    for i in range(bin_size):
        h0 = (i * H) // bin_size
        h1 = -((-(i + 1) * H) // bin_size)
        cols = []
        for j in range(bin_size):
            w0 = (j * W) // bin_size
            w1 = -((-(j + 1) * W) // bin_size)
            cols.append(jnp.mean(x_nchw[:, :, h0:h1, w0:w1], axis=(2, 3)))
        rows.append(jnp.stack(cols, axis=-1))
    return jnp.stack(rows, axis=-2)                      # (N, C, bin, bin)


def _upsample_bilinear_ref(x_nchw, out_h, out_w):
    _, _, H, W = x_nchw.shape

    def coords(out_size, in_size):
        if out_size == 1:
            src = jnp.zeros((out_size,), jnp.float32)
        else:
            src = jnp.arange(out_size, dtype=jnp.float32) * (
                (in_size - 1) / (out_size - 1))
        i0 = jnp.clip(jnp.floor(src).astype(jnp.int32), 0, in_size - 1)
        i1 = jnp.clip(i0 + 1, 0, in_size - 1)
        return i0, i1, src - i0.astype(jnp.float32)

    h0, h1, fh = coords(out_h, H)
    w0, w1, fw = coords(out_w, W)
    fh_ = fh[None, None, :, None]
    fw_ = fw[None, None, None, :]
    top = (x_nchw[:, :, h0][:, :, :, w0] * (1 - fw_)
           + x_nchw[:, :, h0][:, :, :, w1] * fw_)
    bot = (x_nchw[:, :, h1][:, :, :, w0] * (1 - fw_)
           + x_nchw[:, :, h1][:, :, :, w1] * fw_)
    return top * (1 - fh_) + bot * fh_


def ppm_reference(x_nchw, pyramids=(1, 2, 3, 6)):
    H, W = x_nchw.shape[2], x_nchw.shape[3]
    feat = x_nchw
    for b in pyramids:
        pooled = _adaptive_avg_pool2d_ref(x_nchw, b)
        feat = feat + _upsample_bilinear_ref(pooled, H, W)
    return feat


if __name__ == "__main__":
    key = jax.random.PRNGKey(0)
    N, C, H, W = 2, 128, 16, 16
    x = jax.random.normal(key, (N, C, H, W), jnp.float32)

    # Auto-picked tiles (whole image per step fits the VMEM budget at this size).
    out = pyramid_pooling_module(x)
    jax.block_until_ready(out)
    assert out.shape == (N, C, H, W) and out.dtype == x.dtype

    ref = ppm_reference(x)
    err = jnp.abs(out - ref)
    # In-kernel MXU f32 matmuls may run at default (bf16-pass) precision while
    # the reference is pure f32 element-wise math, so allow a few 1e-2 of slack.
    assert float(jnp.max(err)) < 1e-1, f"max err {float(jnp.max(err))}"
    assert float(jnp.mean(err)) < 1e-2, f"mean err {float(jnp.mean(err))}"

    # Exercise the explicit spatial-tiling / pooling-accumulation grid path.
    out_tiled = pyramid_pooling_module(x, tile_h=4, tile_c=128)
    jax.block_until_ready(out_tiled)
    err_t = jnp.abs(out_tiled - ref)
    assert float(jnp.max(err_t)) < 1e-1, f"max err (tiled) {float(jnp.max(err_t))}"

    print("KERNEL_OK")
</pallas_src>

<mosaic_0001>
module attributes {stable_mosaic.version = 11 : i64} {
  func.func @_ppm_pool_kernel(%arg0: i32, %arg1: i32, %arg2: i32, %arg3: memref<1x16x16x128xf32, #tpu.memory_space<vmem>>, %arg4: memref<16x16x128xf32, #tpu.memory_space<vmem>>, %arg5: memref<1x128x128xf32, #tpu.memory_space<vmem>>) attributes {dimension_semantics = [#tpu.dimension_semantics<parallel>, #tpu.dimension_semantics<parallel>, #tpu.dimension_semantics<arbitrary>], iteration_bounds = array<i64: 2, 1, 1>, scalar_prefetch = 0 : i64, scratch_operands = 0 : i64, tpu.core_type = #tpu.core_type<tc>, window_params = [{transform_indices = @transform_0, window_bounds = array<i64: 1, 16, 16, 128>}, {transform_indices = @transform_1, window_bounds = array<i64: 16, 16, 128>}, {transform_indices = @transform_2, window_bounds = array<i64: 1, 128, 128>}]} {
    %c0_i32 = arith.constant 0 : i32
    %0 = arith.cmpi eq, %arg2, %c0_i32 : i32
    %1 = arith.extui %0 : i1 to i32
    %c0_i32_0 = arith.constant 0 : i32
    %2 = arith.cmpi ne, %1, %c0_i32_0 : i32
    scf.if %2 {
      %cst_13 = arith.constant 0.000000e+00 : f32
      %16 = vector.broadcast %cst_13 : f32 to vector<128x128xf32>
      %c0_14 = arith.constant 0 : index
      %c0_15 = arith.constant 0 : index
      %c0_16 = arith.constant 0 : index
      %17 = vector.load %arg5[%c0_14, %c0_15, %c0_16] : memref<1x128x128xf32, #tpu.memory_space<vmem>>, vector<1x128x128xf32>
      %18 = vector.shape_cast %17 : vector<1x128x128xf32> to vector<128x128xf32>
      %19 = vector.shape_cast %16 : vector<128x128xf32> to vector<1x128x128xf32>
      tpu.vector_store %arg5[%c0_14, %c0_15, %c0_16], %19 {strides = array<i32>} : memref<1x128x128xf32, #tpu.memory_space<vmem>>, vector<1x128x128xf32>,
    } else {
    }
    %c0 = arith.constant 0 : index
    %c0_1 = arith.constant 0 : index
    %c0_2 = arith.constant 0 : index
    %c0_3 = arith.constant 0 : index
    %3 = vector.load %arg3[%c0, %c0_1, %c0_2, %c0_3] : memref<1x16x16x128xf32, #tpu.memory_space<vmem>>, vector<1x16x16x128xf32>
    %4 = vector.shape_cast %3 : vector<1x16x16x128xf32> to vector<16x16x128xf32>
    %5 = vector.shape_cast %4 : vector<16x16x128xf32> to vector<256x128xf32>
    %c0_4 = arith.constant 0 : index
    %c0_5 = arith.constant 0 : index
    %c0_6 = arith.constant 0 : index
    %6 = vector.load %arg4[%c0_4, %c0_5, %c0_6] : memref<16x16x128xf32, #tpu.memory_space<vmem>>, vector<16x16x128xf32>
    %7 = vector.shape_cast %6 : vector<16x16x128xf32> to vector<256x128xf32>
    %c0_7 = arith.constant 0 : index
    %c0_8 = arith.constant 0 : index
    %c0_9 = arith.constant 0 : index
    %8 = vector.load %arg5[%c0_7, %c0_8, %c0_9] : memref<1x128x128xf32, #tpu.memory_space<vmem>>, vector<1x128x128xf32>
    %9 = vector.shape_cast %8 : vector<1x128x128xf32> to vector<128x128xf32>
    %10 = tpu.transpose %7, [1, 0] : vector<256x128xf32> -> vector<128x256xf32>
    %cst = arith.constant dense<0.000000e+00> : vector<128x128xf32>
    %11 = tpu.matmul %10, %5, %cst {dimension_numbers = #tpu.dot_dimension_numbers<[1], [0], [0], [1], [0, 0, 1, 1], [], []>} : vector<128x256xf32>, vector<256x128xf32>, vector<128x128xf32> -> vector<128x128xf32>
    %12 = arith.addf %9, %11 : vector<128x128xf32>
    %c0_10 = arith.constant 0 : index
    %c0_11 = arith.constant 0 : index
    %c0_12 = arith.constant 0 : index
    %13 = vector.load %arg5[%c0_10, %c0_11, %c0_12] : memref<1x128x128xf32, #tpu.memory_space<vmem>>, vector<1x128x128xf32>
    %14 = vector.shape_cast %13 : vector<1x128x128xf32> to vector<128x128xf32>
    %15 = vector.shape_cast %12 : vector<128x128xf32> to vector<1x128x128xf32>
    tpu.vector_store %arg5[%c0_10, %c0_11, %c0_12], %15 {strides = array<i32>} : memref<1x128x128xf32, #tpu.memory_space<vmem>>, vector<1x128x128xf32>,
    return
  }
  func.func @transform_0(%arg0: i32, %arg1: i32, %arg2: i32) -> (i32, i32, i32, i32) {
    %c0_i32 = arith.constant 0 : i32
    %c0_i32_0 = arith.constant 0 : i32
    return %arg0, %arg2, %c0_i32, %arg1 : i32, i32, i32, i32
  }
  func.func @transform_1(%arg0: i32, %arg1: i32, %arg2: i32) -> (i32, i32, i32) {
    %c0_i32 = arith.constant 0 : i32
    %c0_i32_0 = arith.constant 0 : i32
    %c0_i32_1 = arith.constant 0 : i32
    return %arg2, %c0_i32, %c0_i32_0 : i32, i32, i32
  }
  func.func @transform_2(%arg0: i32, %arg1: i32, %arg2: i32) -> (i32, i32, i32) {
    %c0_i32 = arith.constant 0 : i32
    %c0_i32_0 = arith.constant 0 : i32
    return %arg0, %c0_i32, %arg1 : i32, i32, i32
  }
}

module attributes {stable_mosaic.version = 11 : i64} {
  func.func @_ppm_upsample_add_kernel(%arg0: i32, %arg1: i32, %arg2: i32, %arg3: memref<1x16x16x128xf32, #tpu.memory_space<vmem>>, %arg4: memref<16x16x128xf32, #tpu.memory_space<vmem>>, %arg5: memref<1x128x128xf32, #tpu.memory_space<vmem>>, %arg6: memref<1x16x16x128xf32, #tpu.memory_space<vmem>>) attributes {dimension_semantics = [#tpu.dimension_semantics<parallel>, #tpu.dimension_semantics<parallel>, #tpu.dimension_semantics<parallel>], iteration_bounds = array<i64: 2, 1, 1>, scalar_prefetch = 0 : i64, scratch_operands = 0 : i64, tpu.core_type = #tpu.core_type<tc>, window_params = [{transform_indices = @transform_0, window_bounds = array<i64: 1, 16, 16, 128>}, {transform_indices = @transform_1, window_bounds = array<i64: 16, 16, 128>}, {transform_indices = @transform_2, window_bounds = array<i64: 1, 128, 128>}, {transform_indices = @transform_3, window_bounds = array<i64: 1, 16, 16, 128>}]} {
    %c0 = arith.constant 0 : index
    %c0_0 = arith.constant 0 : index
    %c0_1 = arith.constant 0 : index
    %c0_2 = arith.constant 0 : index
    %0 = vector.load %arg3[%c0, %c0_0, %c0_1, %c0_2] : memref<1x16x16x128xf32, #tpu.memory_space<vmem>>, vector<1x16x16x128xf32>
    %1 = vector.shape_cast %0 : vector<1x16x16x128xf32> to vector<16x16x128xf32>
    %2 = vector.shape_cast %1 : vector<16x16x128xf32> to vector<256x128xf32>
    %c0_3 = arith.constant 0 : index
    %c0_4 = arith.constant 0 : index
    %c0_5 = arith.constant 0 : index
    %3 = vector.load %arg4[%c0_3, %c0_4, %c0_5] : memref<16x16x128xf32, #tpu.memory_space<vmem>>, vector<16x16x128xf32>
    %4 = vector.shape_cast %3 : vector<16x16x128xf32> to vector<256x128xf32>
    %c0_6 = arith.constant 0 : index
    %c0_7 = arith.constant 0 : index
    %c0_8 = arith.constant 0 : index
    %5 = vector.load %arg5[%c0_6, %c0_7, %c0_8] : memref<1x128x128xf32, #tpu.memory_space<vmem>>, vector<1x128x128xf32>
    %6 = vector.shape_cast %5 : vector<1x128x128xf32> to vector<128x128xf32>
    %cst = arith.constant dense<0.000000e+00> : vector<256x128xf32>
    %7 = tpu.matmul %4, %6, %cst {dimension_numbers = #tpu.dot_dimension_numbers<[1], [0], [0], [1], [0, 0, 1, 1], [], []>} : vector<256x128xf32>, vector<128x128xf32>, vector<256x128xf32> -> vector<256x128xf32>
    %8 = arith.addf %2, %7 : vector<256x128xf32>
    %9 = vector.shape_cast %8 : vector<256x128xf32> to vector<16x16x128xf32>
    %c0_9 = arith.constant 0 : index
    %c0_10 = arith.constant 0 : index
    %c0_11 = arith.constant 0 : index
    %c0_12 = arith.constant 0 : index
    %10 = vector.load %arg6[%c0_9, %c0_10, %c0_11, %c0_12] : memref<1x16x16x128xf32, #tpu.memory_space<vmem>>, vector<1x16x16x128xf32>
    %11 = vector.shape_cast %10 : vector<1x16x16x128xf32> to vector<16x16x128xf32>
    %12 = vector.shape_cast %9 : vector<16x16x128xf32> to vector<1x16x16x128xf32>
    tpu.vector_store %arg6[%c0_9, %c0_10, %c0_11, %c0_12], %12 {strides = array<i32>} : memref<1x16x16x128xf32, #tpu.memory_space<vmem>>, vector<1x16x16x128xf32>,
    return
  }
  func.func @transform_0(%arg0: i32, %arg1: i32, %arg2: i32) -> (i32, i32, i32, i32) {
    %c0_i32 = arith.constant 0 : i32
    %c0_i32_0 = arith.constant 0 : i32
    return %arg0, %arg1, %c0_i32, %arg2 : i32, i32, i32, i32
  }
  func.func @transform_1(%arg0: i32, %arg1: i32, %arg2: i32) -> (i32, i32, i32) {
    %c0_i32 = arith.constant 0 : i32
    %c0_i32_0 = arith.constant 0 : i32
    %c0_i32_1 = arith.constant 0 : i32
    return %arg1, %c0_i32, %c0_i32_0 : i32, i32, i32
  }
  func.func @transform_2(%arg0: i32, %arg1: i32, %arg2: i32) -> (i32, i32, i32) {
    %c0_i32 = arith.constant 0 : i32
    %c0_i32_0 = arith.constant 0 : i32
    return %arg0, %c0_i32, %arg2 : i32, i32, i32
  }
  func.func @transform_3(%arg0: i32, %arg1: i32, %arg2: i32) -> (i32, i32, i32, i32) {
    %c0_i32 = arith.constant 0 : i32
    %c0_i32_0 = arith.constant 0 : i32
    return %arg0, %arg1, %c0_i32, %arg2 : i32, i32, i32, i32
  }
}

</mosaic_0001>

<bundles_post_ra>
// kernel: pyramid_pooling_module.3
= control target key start
LH: loop header
LB: loop body
LE: loop exit
PB: predicated region body
PF: predicated region fallthrough
CT: control target
= control target key end

     0   :  { %8 = vsyncpa [#allocation3], 0  ;;  %s1433_s0 = inlined_call_operand.vmem [shape: f32[2,16,16,128], index: 0, kind: input, shape index: {}]   ;;  %s1434_s1 = inlined_call_operand.vmem [shape: f32[16,16,128], index: 1, kind: input, shape index: {}]   ;;  %s1435_s2 = inlined_call_operand.vmem [shape: f32[2,128,128], index: 2, kind: input, shape index: {}]   ;;  %s1436_s3 = inlined_call_operand.hbm [shape: f32[2,16,16,128], index: 3, kind: output, shape index: {}]  }
   0x1   :  { %10 = vsyncpa [#allocation3 + $0x1], 0  ;;  %s1125_s12 = smov 0   ;;  %s1127_s13 = smov 0  }
   0x2   :  { %s1129_s14 = smov 0   ;;  %s1131_s15 = smov 0  }
   0x3   :  { %s1133_s16 = smov 0   ;;  %s1135_s17 = smov 0  }
   0x4 LB: > { %s788_s18 = sadd.s32 4294967295, %s1100_s17   ;;  %s789_s19 = sadd.s32 4294967294, %s1100_s17   ;;  %s1100_s17 = sphi %s1135_s17, %s16_s17   ;;  %s1096_s16 = sphi %s1133_s16, %s1443_s16   ;;  %s1092_s15 = sphi %s1131_s15, %s1442_s15   ;;  %s1088_s14 = sphi %s1129_s14, %s1441_s14   ;;  %s1084_s13 = sphi %s1127_s13, %s1440_s13   ;;  %s1080_s12 = sphi %s1125_s12, %s1439_s12  }
   0x5   : > { %s35_s20 = sadd.s32 1, %s1096_s16  ;;  %s130_s21 = sadd.s32 1, %s1088_s14 }
   0x6   : > { %p37_p0 = scmp.ge.s32.totalorder %s35_s20, 2  ;;  %p140_p1 = scmp.ne.s32.totalorder %s1088_s14, %s1084_s13 }
   0x7   : > { %p141_p2 = scmp.eq.s32.totalorder %s788_s18, 1  ;;  %p146_p3 = scmp.ne.s32.totalorder %s1084_s13, %s1080_s12 }
   0x8   : > { %s1445_s20 = smov (%p37_p0, %s35_s20), 0  ;;  %p147_p5 = scmp.eq.s32.totalorder %s789_s19, 1 }
   0x9   : > { %p1165_p4 = por %p141_p2, %p140_p1  ;;  %s123_s23 = ssub.s32 %s1096_s16, %s1445_s20 }
   0xa   : > { %p793_p6 = scmp.ge.s32.totalorder %s1100_s17, 1  ;;  %p128_p7 = scmp.eq.s32.totalorder %s123_s23, 0 }
   0xb   : > { %p1172_p8 = por %p147_p5, %p146_p3  ;;  %p203_p9 = scmp.lt.s32.totalorder %s1100_s17, 3 }
   0xc   : > { %s1178_s25 = scalar_select %p128_p7, %s1088_s14, %s130_s21  }
   0xd   : > { %p204_p10 = pnand %p793_p6, %p203_p9 }
   0xe   : > { %p250_p11 = scmp.lt.s32.totalorder (!%p204_p10), %s1092_s15, 1  ;;  %s246_s5 = sand.u32 (!%p204_p10), 1, %s1084_s13  }
   0xf   : > { %207 = sbr.rel (%p204_p10) target bundleno = 296 (0x128), region = 32  ;;  %s794_s9 = sshll.u32 (!%p204_p10), %s246_s5, 8 }
  0x10   : > { %s806_s10 = sshll.u32 (!%p204_p10), %s1092_s15, 12  ;;  %s1102_s26 = smov (!%p204_p10), [#allocation2]  }
  0x11   : > { %s1378_s21 = scalar_lea.hbm (!%p204_p10), %s1436_s3, %s806_s10  ;;  %s1028_s27 = sshll.u32 (!%p204_p10), %s1102_s26, 4  ;;  %s1029_s27 = int_to_ptr.vmem [resolvable:$false] %s1028_s27 }
  0x12   : > { %s1030_s28 = scalar_lea.vmem (!%p204_p10), %s1029_s27, 8192 }
  0x14   : > { %v311_v0 = vld [vmem:[%s1434_s1] sm:$0xff]  ;;  %s1188_s30 = scalar_select %p250_p11, %s1092_s15, 1  ;;  %v312_v18 = vld [vmem:[%s1434_s1 + $0x8] sm:$0xff]  ;;  %v313_v20 = vld [vmem:[%s1434_s1 + $0x10] sm:$0xff] }
  0x15   : > { %v327_v1 = vld [vmem:[%s1434_s1 + $0x80] sm:$0xff]  ;;  %887 = vmatprep.mubr.f32.mxu0 %v311_v0  ;;  %v328_v19 = vld [vmem:[%s1434_s1 + $0x88] sm:$0xff]  ;;  %v329_v21 = vld [vmem:[%s1434_s1 + $0x90] sm:$0xff]  ;;  %s1388_s15 = scalar_lea.sflag [#allocation3], %s246_s5 }
  0x16   : > { %911 = vmatprep.mubr.f32.mxu1 %v327_v1  ;;  %s805_s4 = sshll.u32 %s1188_s30, 7  ;;  %v314_v22 = vld [vmem:[%s1434_s1 + $0x18] sm:$0xff]  ;;  %v315_v24 = vld [vmem:[%s1434_s1 + $0x20] sm:$0xff]  ;;  %v316_v26 = vld [vmem:[%s1434_s1 + $0x28] sm:$0xff] }
  0x17   : > { %s1194_s7 = scalar_lea.vmem %s1435_s2, %s805_s4  ;;  %v330_v23 = vld [vmem:[%s1434_s1 + $0x98] sm:$0xff]  ;;  %v331_v25 = vld [vmem:[%s1434_s1 + $0xa0] sm:$0xff]  ;;  %v332_v27 = vld [vmem:[%s1434_s1 + $0xa8] sm:$0xff]  ;;  %s804_s4 = sshll.u32 %s1188_s30, 8 }
  0x18   : > { %v358_v2 = vld [vmem:[%s1194_s7 + $0x78] sm:$0xff]  ;;  %v357_v3 = vld [vmem:[%s1194_s7 + $0x70] sm:$0xff]  ;;  %v356_v4 = vld [vmem:[%s1194_s7 + $0x68] sm:$0xff]  ;;  %s1307_s8 = scalar_lea.vmem %s1433_s0, %s804_s4  ;;  %s1317_s30 = scalar_lea.vmem [#allocation2], %s794_s9 }
  0x19   : > { %855 = vmatprep.subr.mxu0 %v358_v2  ;;  %935 = vmatprep.subr.mxu1 %v358_v2  ;;  %v355_v5 = vld [vmem:[%s1194_s7 + $0x60] sm:$0xff]  ;;  %v354_v6 = vld [vmem:[%s1194_s7 + $0x58] sm:$0xff]  ;;  %v353_v7 = vld [vmem:[%s1194_s7 + $0x50] sm:$0xff]  ;;  %s666_s11 = sshll.u32 %s1317_s30, 4  ;;  %s1380_s11 = int_to_ptr.vmem [resolvable:$true] %s666_s11 }
  0x1a   : > { %856 = vmatpush3.msra.mxu0 %v358_v2  ;;  %951 = vmatpush3.msra.mxu1 %v358_v2  ;;  %v352_v8 = vld [vmem:[%s1194_s7 + $0x48] sm:$0xff]  ;;  %v351_v9 = vld [vmem:[%s1194_s7 + $0x40] sm:$0xff]  ;;  %v350_v10 = vld [vmem:[%s1194_s7 + $0x38] sm:$0xff]  ;;  %s1024_s23 = scalar_lea.vmem %s1380_s11, 4096  ;;  %p1031_p1 = scmp.lt.s32.totalorder %s1380_s11, %s1029_s27 }
  0x1b   : > { %857 = vmatprep.subr.mxu0 %v357_v3  ;;  %936 = vmatprep.subr.mxu1 %v357_v3  ;;  %v349_v11 = vld [vmem:[%s1194_s7 + $0x30] sm:$0xff]  ;;  %v348_v12 = vld [vmem:[%s1194_s7 + $0x28] sm:$0xff]  ;;  %v347_v13 = vld [vmem:[%s1194_s7 + $0x20] sm:$0xff]  ;;  %p1025_p12 = scmp.ne.s32.totalorder %s1380_s11, %s1024_s23  ;;  %p1032_p2 = scmp.lt.s32.totalorder %s1030_s28, %s1024_s23 }
  0x1c   : > { %858 = vmatpush3.msra.mxu0 %v357_v3  ;;  %952 = vmatpush3.msra.mxu1 %v357_v3  ;;  %v346_v14 = vld [vmem:[%s1194_s7 + $0x18] sm:$0xff]  ;;  %v345_v15 = vld [vmem:[%s1194_s7 + $0x10] sm:$0xff]  ;;  %v344_v16 = vld [vmem:[%s1194_s7 + $0x8] sm:$0xff] }
  0x1d   : > { %859 = vmatprep.subr.mxu0 %v356_v4  ;;  %937 = vmatprep.subr.mxu1 %v356_v4  ;;  %v343_v17 = vld [vmem:[%s1194_s7] sm:$0xff]  ;;  %v317_v28 = vld [vmem:[%s1434_s1 + $0x30] sm:$0xff]  ;;  %v318_v30 = vld [vmem:[%s1434_s1 + $0x38] sm:$0xff]  ;;  %p1026_p13 = pnand %p1025_p12, %p1165_p4  ;;  %p1033_p3 = por %p1032_p2, %p1031_p1 }
  0x1e   : > { %860 = vmatpush3.msra.mxu0 %v356_v4  ;;  %953 = vmatpush3.msra.mxu1 %v356_v4  ;;  %v333_v29 = vld [vmem:[%s1434_s1 + $0xb0] sm:$0xff]  ;;  %v334_v31 = vld [vmem:[%s1434_s1 + $0xb8] sm:$0xff]  ;;  %v319_v32 = vld [vmem:[%s1434_s1 + $0x40] sm:$0xff] }
  0x1f   : > { %861 = vmatprep.subr.mxu0 %v355_v5  ;;  %938 = vmatprep.subr.mxu1 %v355_v5  ;;  %v335_v33 = vld [vmem:[%s1434_s1 + $0xc0] sm:$0xff]  ;;  %v320_v34 = vld [vmem:[%s1434_s1 + $0x48] sm:$0xff]  ;;  %v321_v36 = vld [vmem:[%s1434_s1 + $0x50] sm:$0xff]  ;;  %p1027_p0 = pneg %p1026_p13 }
  0x20   : > { %862 = vmatpush3.msra.mxu0 %v355_v5  ;;  %954 = vmatpush3.msra.mxu1 %v355_v5  ;;  %v336_v35 = vld [vmem:[%s1434_s1 + $0xc8] sm:$0xff]  ;;  %v337_v37 = vld [vmem:[%s1434_s1 + $0xd0] sm:$0xff]  ;;  %v322_v38 = vld [vmem:[%s1434_s1 + $0x58] sm:$0xff] }
  0x21   : > { %863 = vmatprep.subr.mxu0 %v354_v6  ;;  %939 = vmatprep.subr.mxu1 %v354_v6  ;;  %v338_v39 = vld [vmem:[%s1434_s1 + $0xd8] sm:$0xff]  ;;  %v323_v40 = vld [vmem:[%s1434_s1 + $0x60] sm:$0xff]  ;;  %v324_v42 = vld [vmem:[%s1434_s1 + $0x68] sm:$0xff]  ;;  %p1034_p5 = pnand %p1033_p3, %p1027_p0 }
  0x22   : > { %864 = vmatpush3.msra.mxu0 %v354_v6  ;;  %955 = vmatpush3.msra.mxu1 %v354_v6  ;;  %v339_v41 = vld [vmem:[%s1434_s1 + $0xe0] sm:$0xff]  ;;  %v340_v43 = vld [vmem:[%s1434_s1 + $0xe8] sm:$0xff]  ;;  %v325_v44 = vld [vmem:[%s1434_s1 + $0x70] sm:$0xff] }
  0x23   : > { %865 = vmatprep.subr.mxu0 %v353_v7  ;;  %940 = vmatprep.subr.mxu1 %v353_v7  ;;  %v341_v45 = vld [vmem:[%s1434_s1 + $0xf0] sm:$0xff]  ;;  %v326_v46 = vld [vmem:[%s1434_s1 + $0x78] sm:$0xff]  ;;  %v280_v48 = vld [vmem:[%s1307_s8 + $0x8] sm:$0xff] }
  0x24   : > { %866 = vmatpush3.msra.mxu0 %v353_v7  ;;  %956 = vmatpush3.msra.mxu1 %v353_v7  ;;  %v342_v47 = vld [vmem:[%s1434_s1 + $0xf8] sm:$0xff]  ;;  %v296_v49 = vld [vmem:[%s1307_s8 + $0x88] sm:$0xff]  ;;  %v279_v52 = vld [vmem:[%s1307_s8] sm:$0xff] }
  0x25   : > { %867 = vmatprep.subr.mxu0 %v352_v8  ;;  %941 = vmatprep.subr.mxu1 %v352_v8  ;;  %v295_v53 = vld [vmem:[%s1307_s8 + $0x80] sm:$0xff]  ;;  %v282_v58 = vld [vmem:[%s1307_s8 + $0x18] sm:$0xff]  ;;  %v281_v0 = vld [vmem:[%s1307_s8 + $0x10] sm:$0xff] }
  0x26   : > { %868 = vmatpush3.msra.mxu0 %v352_v8  ;;  %957 = vmatpush3.msra.mxu1 %v352_v8  ;;  %v298_v59 = vld [vmem:[%s1307_s8 + $0x98] sm:$0xff]  ;;  %v297_v1 = vld [vmem:[%s1307_s8 + $0x90] sm:$0xff]  ;;  %v284_v6 = vld [vmem:[%s1307_s8 + $0x28] sm:$0xff] }
  0x27   : > { %869 = vmatprep.subr.mxu0 %v351_v9  ;;  %942 = vmatprep.subr.mxu1 %v351_v9  ;;  %v300_v7 = vld [vmem:[%s1307_s8 + $0xa8] sm:$0xff] }
  0x28   : > { %870 = vmatpush3.msra.mxu0 %v351_v9  ;;  %958 = vmatpush3.msra.mxu1 %v351_v9 }
  0x29   : > { %871 = vmatprep.subr.mxu0 %v350_v10  ;;  %943 = vmatprep.subr.mxu1 %v350_v10 }
  0x2a   : > { %872 = vmatpush3.msra.mxu0 %v350_v10  ;;  %959 = vmatpush3.msra.mxu1 %v350_v10 }
  0x2b   : > { %873 = vmatprep.subr.mxu0 %v349_v11  ;;  %944 = vmatprep.subr.mxu1 %v349_v11 }
  0x2c   : > { %874 = vmatpush3.msra.mxu0 %v349_v11  ;;  %960 = vmatpush3.msra.mxu1 %v349_v11 }
  0x2d   : > { %875 = vmatprep.subr.mxu0 %v348_v12  ;;  %945 = vmatprep.subr.mxu1 %v348_v12 }
  0x2e   : > { %876 = vmatpush3.msra.mxu0 %v348_v12  ;;  %961 = vmatpush3.msra.mxu1 %v348_v12  ;;  %v283_v12 = vld [vmem:[%s1307_s8 + $0x20] sm:$0xff] }
  0x2f   : > { %877 = vmatprep.subr.mxu0 %v347_v13  ;;  %946 = vmatprep.subr.mxu1 %v347_v13 }
  0x30   : > { %878 = vmatpush3.msra.mxu0 %v347_v13  ;;  %962 = vmatpush3.msra.mxu1 %v347_v13  ;;  %v299_v13 = vld [vmem:[%s1307_s8 + $0xa0] sm:$0xff] }
  0x31   : > { %879 = vmatprep.subr.mxu0 %v346_v14  ;;  %947 = vmatprep.subr.mxu1 %v346_v14 }
  0x32   : > { %880 = vmatpush3.msra.mxu0 %v346_v14  ;;  %963 = vmatpush3.msra.mxu1 %v346_v14 }
  0x33   : > { %881 = vmatprep.subr.mxu0 %v345_v15  ;;  %948 = vmatprep.subr.mxu1 %v345_v15 }
  0x34   : > { %882 = vmatpush3.msra.mxu0 %v345_v15  ;;  %964 = vmatpush3.msra.mxu1 %v345_v15 }
  0x35   : > { %883 = vmatprep.subr.mxu0 %v344_v16  ;;  %949 = vmatprep.subr.mxu1 %v344_v16 }
  0x36   : > { %884 = vmatpush3.msra.mxu0 %v344_v16  ;;  %965 = vmatpush3.msra.mxu1 %v344_v16 }
  0x37   : > { %885 = vmatprep.subr.mxu0 %v343_v17  ;;  %950 = vmatprep.subr.mxu1 %v343_v17 }
  0x38   : > { %886 = vmatpush3.msra.mxu0 %v343_v17  ;;  %966 = vmatpush3.msra.mxu1 %v343_v17 }
  0x39   : > { %888 = vmatmul.mubr.f32.vlgmr.msra.gmra.mxu0 %v312_v18  ;;  %912 = vmatmul.mubr.f32.vlgmr.msra.gmra.mxu1 %v328_v19  ;;  %v286_v18 = vld [vmem:[%s1307_s8 + $0x38] sm:$0xff] }
  0x3a   : > { %890 = vmatprep.mubr.f32.mxu0 %v313_v20  ;;  %914 = vmatprep.mubr.f32.mxu1 %v329_v21  ;;  %v302_v19 = vld [vmem:[%s1307_s8 + $0xb8] sm:$0xff] }
  0x3d   : > { %891 = vmatmul.mubr.f32.gmra.mxu0 %v314_v22  ;;  %915 = vmatmul.mubr.f32.gmra.mxu1 %v330_v23 }
  0x3e   : > { %893 = vmatprep.mubr.f32.mxu0 %v315_v24  ;;  %917 = vmatprep.mubr.f32.mxu1 %v331_v25  ;;  %v285_v24 = vld [vmem:[%s1307_s8 + $0x30] sm:$0xff] }
  0x3f   : > { %v301_v25 = vld [vmem:[%s1307_s8 + $0xb0] sm:$0xff] }
  0x41   : > { %894 = vmatmul.mubr.f32.gmra.mxu0 %v316_v26  ;;  %918 = vmatmul.mubr.f32.gmra.mxu1 %v332_v27 }
  0x42   : > { %896 = vmatprep.mubr.f32.mxu0 %v317_v28  ;;  %920 = vmatprep.mubr.f32.mxu1 %v333_v29 }
  0x45   : > { %897 = vmatmul.mubr.f32.gmra.mxu0 %v318_v30  ;;  %921 = vmatmul.mubr.f32.gmra.mxu1 %v334_v31  ;;  %v288_v30 = vld [vmem:[%s1307_s8 + $0x48] sm:$0xff] }
  0x46   : > { %899 = vmatprep.mubr.f32.mxu0 %v319_v32  ;;  %923 = vmatprep.mubr.f32.mxu1 %v335_v33  ;;  %v304_v31 = vld [vmem:[%s1307_s8 + $0xc8] sm:$0xff] }
  0x49   : > { %900 = vmatmul.mubr.f32.gmra.mxu0 %v320_v34  ;;  %924 = vmatmul.mubr.f32.gmra.mxu1 %v336_v35 }
  0x4a   : > { %902 = vmatprep.mubr.f32.mxu0 %v321_v36  ;;  %926 = vmatprep.mubr.f32.mxu1 %v337_v37  ;;  %v287_v36 = vld [vmem:[%s1307_s8 + $0x40] sm:$0xff] }
  0x4b   : > { %v303_v37 = vld [vmem:[%s1307_s8 + $0xc0] sm:$0xff] }
  0x4d   : > { %903 = vmatmul.mubr.f32.gmra.mxu0 %v322_v38  ;;  %927 = vmatmul.mubr.f32.gmra.mxu1 %v338_v39 }
  0x4e   : > { %905 = vmatprep.mubr.f32.mxu0 %v323_v40  ;;  %929 = vmatprep.mubr.f32.mxu1 %v339_v41 }
  0x51   : > { %906 = vmatmul.mubr.f32.gmra.mxu0 %v324_v42  ;;  %930 = vmatmul.mubr.f32.gmra.mxu1 %v340_v43  ;;  %v290_v42 = vld [vmem:[%s1307_s8 + $0x58] sm:$0xff] }
  0x52   : > { %908 = vmatprep.mubr.f32.mxu0 %v325_v44  ;;  %932 = vmatprep.mubr.f32.mxu1 %v341_v45  ;;  %v306_v43 = vld [vmem:[%s1307_s8 + $0xd8] sm:$0xff] }
  0x55   : > { %909 = vmatmul.mubr.f32.gmra.mxu0 %v326_v46  ;;  %933 = vmatmul.mubr.f32.gmra.mxu1 %v342_v47 }
  0xf9   : > { %v889_v50 = vpop.f32.mrf.mxu0  ;;  %v913_v51 = vpop.f32.mrf.mxu1 }
  0xfa   : > { %v585_v54 = vadd.f32 %v889_v50, %v280_v48  ;;  %v601_v55 = vadd.f32 %v913_v51, %v296_v49  ;;  %v289_v48 = vld [vmem:[%s1307_s8 + $0x50] sm:$0xff] }
  0xfb   : > { %v425_v56 = vpop.f32.mrf.mxu0  ;;  %v505_v57 = vpop.f32.mrf.mxu1  ;;  %v305_v49 = vld [vmem:[%s1307_s8 + $0xd0] sm:$0xff] }
  0xfc   : > { %617 = vst [vmem:[%s1317_s30 + $0x8] sm:$0xff] %v585_v54  ;;  %633 = vst [vmem:[%s1317_s30 + $0x88] sm:$0xff] %v601_v55  ;;  %v584_v60 = vadd.f32 %v425_v56, %v279_v52  ;;  %v600_v61 = vadd.f32 %v505_v57, %v295_v53  ;;  %v292_v54 = vld [vmem:[%s1307_s8 + $0x68] sm:$0xff] }
  0xfd   : > { %v892_v62 = vpop.f32.mrf.mxu0  ;;  %v916_v63 = vpop.f32.mrf.mxu1  ;;  %v308_v55 = vld [vmem:[%s1307_s8 + $0xe8] sm:$0xff] }
  0xfe   : > { %616 = vst [vmem:[%s1317_s30] sm:$0xff] %v584_v60  ;;  %632 = vst [vmem:[%s1317_s30 + $0x80] sm:$0xff] %v600_v61  ;;  %v587_v2 = vadd.f32 %v892_v62, %v282_v58  ;;  %v603_v3 = vadd.f32 %v916_v63, %v298_v59  ;;  %v291_v60 = vld [vmem:[%s1307_s8 + $0x60] sm:$0xff] }
  0xff   : > { %v435_v4 = vpop.f32.mrf.mxu0  ;;  %v515_v5 = vpop.f32.mrf.mxu1  ;;  %v307_v61 = vld [vmem:[%s1307_s8 + $0xe0] sm:$0xff] }
 0x100   : > { %619 = vst [vmem:[%s1317_s30 + $0x18] sm:$0xff] %v587_v2  ;;  %635 = vst [vmem:[%s1317_s30 + $0x98] sm:$0xff] %v603_v3  ;;  %v586_v8 = vadd.f32 %v435_v4, %v281_v0  ;;  %v602_v9 = vadd.f32 %v515_v5, %v297_v1  ;;  %v294_v2 = vld [vmem:[%s1307_s8 + $0x78] sm:$0xff] }
 0x101   : > { %v895_v10 = vpop.f32.mrf.mxu0  ;;  %v919_v11 = vpop.f32.mrf.mxu1  ;;  %v310_v3 = vld [vmem:[%s1307_s8 + $0xf8] sm:$0xff] }
 0x102   : > { %618 = vst [vmem:[%s1317_s30 + $0x10] sm:$0xff] %v586_v8  ;;  %634 = vst [vmem:[%s1317_s30 + $0x90] sm:$0xff] %v602_v9  ;;  %v589_v14 = vadd.f32 %v895_v10, %v284_v6  ;;  %v605_v15 = vadd.f32 %v919_v11, %v300_v7  ;;  %v293_v8 = vld [vmem:[%s1307_s8 + $0x70] sm:$0xff] }
 0x103   : > { %v445_v16 = vpop.f32.mrf.mxu0  ;;  %v525_v17 = vpop.f32.mrf.mxu1  ;;  %v309_v9 = vld [vmem:[%s1307_s8 + $0xf0] sm:$0xff] }
 0x104   : > { %621 = vst [vmem:[%s1317_s30 + $0x28] sm:$0xff] %v589_v14  ;;  %637 = vst [vmem:[%s1317_s30 + $0xa8] sm:$0xff] %v605_v15  ;;  %v588_v20 = vadd.f32 %v445_v16, %v283_v12  ;;  %v604_v21 = vadd.f32 %v525_v17, %v299_v13 }
 0x105   : > { %v898_v22 = vpop.f32.mrf.mxu0  ;;  %v922_v23 = vpop.f32.mrf.mxu1 }
 0x106   : > { %620 = vst [vmem:[%s1317_s30 + $0x20] sm:$0xff] %v588_v20  ;;  %636 = vst [vmem:[%s1317_s30 + $0xa0] sm:$0xff] %v604_v21  ;;  %v591_v26 = vadd.f32 %v898_v22, %v286_v18  ;;  %v607_v27 = vadd.f32 %v922_v23, %v302_v19 }
 0x107   : > { %v455_v28 = vpop.f32.mrf.mxu0  ;;  %v535_v29 = vpop.f32.mrf.mxu1 }
 0x108   : > { %623 = vst [vmem:[%s1317_s30 + $0x38] sm:$0xff] %v591_v26  ;;  %639 = vst [vmem:[%s1317_s30 + $0xb8] sm:$0xff] %v607_v27  ;;  %v590_v32 = vadd.f32 %v455_v28, %v285_v24  ;;  %v606_v33 = vadd.f32 %v535_v29, %v301_v25 }
 0x109   : > { %v901_v34 = vpop.f32.mrf.mxu0  ;;  %v925_v35 = vpop.f32.mrf.mxu1 }
 0x10a   : > { %622 = vst [vmem:[%s1317_s30 + $0x30] sm:$0xff] %v590_v32  ;;  %638 = vst [vmem:[%s1317_s30 + $0xb0] sm:$0xff] %v606_v33  ;;  %v593_v38 = vadd.f32 %v901_v34, %v288_v30  ;;  %v609_v39 = vadd.f32 %v925_v35, %v304_v31 }
 0x10b   : > { %v465_v40 = vpop.f32.mrf.mxu0  ;;  %v545_v41 = vpop.f32.mrf.mxu1 }
 0x10c   : > { %625 = vst [vmem:[%s1317_s30 + $0x48] sm:$0xff] %v593_v38  ;;  %641 = vst [vmem:[%s1317_s30 + $0xc8] sm:$0xff] %v609_v39  ;;  %v592_v44 = vadd.f32 %v465_v40, %v287_v36  ;;  %v608_v45 = vadd.f32 %v545_v41, %v303_v37 }
 0x10d   : > { %v904_v46 = vpop.f32.mrf.mxu0  ;;  %v928_v47 = vpop.f32.mrf.mxu1 }
 0x10e   : > { %624 = vst [vmem:[%s1317_s30 + $0x40] sm:$0xff] %v592_v44  ;;  %640 = vst [vmem:[%s1317_s30 + $0xc0] sm:$0xff] %v608_v45  ;;  %v595_v50 = vadd.f32 %v904_v46, %v290_v42  ;;  %v611_v51 = vadd.f32 %v928_v47, %v306_v43 }
 0x10f   : > { %v475_v52 = vpop.f32.mrf.mxu0  ;;  %v555_v53 = vpop.f32.mrf.mxu1 }
 0x110   : > { %627 = vst [vmem:[%s1317_s30 + $0x58] sm:$0xff] %v595_v50  ;;  %643 = vst [vmem:[%s1317_s30 + $0xd8] sm:$0xff] %v611_v51  ;;  %v594_v56 = vadd.f32 %v475_v52, %v289_v48  ;;  %v610_v57 = vadd.f32 %v555_v53, %v305_v49 }
 0x111   : > { %v907_v58 = vpop.f32.mrf.mxu0  ;;  %v931_v59 = vpop.f32.mrf.mxu1 }
 0x112   : > { %626 = vst [vmem:[%s1317_s30 + $0x50] sm:$0xff] %v594_v56  ;;  %642 = vst [vmem:[%s1317_s30 + $0xd0] sm:$0xff] %v610_v57  ;;  %v597_v62 = vadd.f32 %v907_v58, %v292_v54  ;;  %v613_v63 = vadd.f32 %v931_v59, %v308_v55 }
 0x113   : > { %v485_v0 = vpop.f32.mrf.mxu0  ;;  %v565_v1 = vpop.f32.mrf.mxu1 }
 0x114   : > { %629 = vst [vmem:[%s1317_s30 + $0x68] sm:$0xff] %v597_v62  ;;  %645 = vst [vmem:[%s1317_s30 + $0xe8] sm:$0xff] %v613_v63  ;;  %v596_v4 = vadd.f32 %v485_v0, %v291_v60  ;;  %v612_v5 = vadd.f32 %v565_v1, %v307_v61 }
 0x115   : > { %v910_v6 = vpop.f32.mrf.mxu0  ;;  %v934_v7 = vpop.f32.mrf.mxu1 }
 0x116   : > { %628 = vst [vmem:[%s1317_s30 + $0x60] sm:$0xff] %v596_v4  ;;  %644 = vst [vmem:[%s1317_s30 + $0xe0] sm:$0xff] %v612_v5  ;;  %v599_v10 = vadd.f32 %v910_v6, %v294_v2  ;;  %v615_v11 = vadd.f32 %v934_v7, %v310_v3 }
 0x117   : > { %v495_v12 = vpop.f32.mrf.mxu0  ;;  %v575_v13 = vpop.f32.mrf.mxu1 }
 0x118   : > { %631 = vst [vmem:[%s1317_s30 + $0x78] sm:$0xff] %v599_v10  ;;  %647 = vst [vmem:[%s1317_s30 + $0xf8] sm:$0xff] %v615_v11  ;;  %v598_v14 = vadd.f32 %v495_v12, %v293_v8  ;;  %v614_v15 = vadd.f32 %v575_v13, %v309_v9 }
 0x11a   : > { %630 = vst [vmem:[%s1317_s30 + $0x70] sm:$0xff] %v598_v14  ;;  %646 = vst [vmem:[%s1317_s30 + $0xf0] sm:$0xff] %v614_v15 }
 0x11b   : > { %1037 = shalt.err (!%p1034_p5)
}
 0x11c   : > { %s1038_s29 = scalar_lea.hbm %s1378_s21, 4096  ;;  %s1042_s6 = scalar_lea.hbm %s1436_s3, 8192 }
 0x11d   : > { %p1039_p6 = scmp.ne.s32.totalorder %s1378_s21, %s1038_s29  ;;  %p1043_p10 = scmp.lt.s32.totalorder %s1378_s21, %s1436_s3 }
 0x11e   : > { %p1044_p11 = scmp.lt.s32.totalorder %s1042_s6, %s1038_s29 }
 0x11f   : > { %p1040_p7 = pnand %p1039_p6, %p1165_p4 }
 0x120   : > { %p1045_p12 = por %p1044_p11, %p1043_p10 }
 0x121   : > { %p1041_p9 = pneg %p1040_p7 }
 0x123   : > { %p1046_p13 = pnand %p1045_p12, %p1041_p9 }
 0x125   : > { %1049 = shalt.err (!%p1046_p13)
}
 0x126   : > { %s1103_s9 = smov 128   ;;  %s1104_s30 = smov 8  }
 0x127   : > { %967 = dma.vmem_to_hbm [thread:$0]  (%p1165_p4), %s1380_s11, 4096, %s1378_s21, %s1388_s15, %s1103_s9, %s1103_s9, %s1104_s30  }
 0x128 PF: > { %p973_p0 = scmp.ge.s32.totalorder %s1100_s17, 2  ;;  %s681_s10 = sand.u32 1, %s1080_s12  }
 0x129   : > { %s682_s18 = scalar_lea.sflag [#allocation3], %s681_s10 }
 0x12a   : > { %p970_p1 = pnand %p973_p0, %p1172_p8 }
 0x12c   : > { %p971_p2 = pneg %p970_p1 }
 0x12e   : > { %1075 = dma.done.wait (%p971_p2), %s682_s18, 4096  }
 0x12f   : > { %1077 = vsyncadd (%p971_p2), %s682_s18, 4294963200  ;;  %s16_s17 = sadd.s32 1, %s1100_s17   ;;  %s1439_s12 = smov %s1084_s13 }
 0x130   : > { %p13_p3 = scmp.ge.s32.totalorder %s16_s17, 4   ;;  %s1440_s13 = smov %s1088_s14 }
 0x131   : > { %s1441_s14 = smov %s1178_s25  ;;  %s1442_s15 = smov %s1096_s16 }
 0x132   : > { %s1443_s16 = smov %s1445_s20  ;;  %15 = sbr.rel (!%p13_p3) target bundleno = 4 (0x4), region = 73 }
 0x137   :  { %687 = vsyncpa [#allocation3], 1 }
 0x138   :  { %689 = vsyncpa [#allocation3 + $0x1], 1 }

// kernel: pyramid_pooling_module.2
= control target key start
LH: loop header
LB: loop body
LE: loop exit
PB: predicated region body
PF: predicated region fallthrough
CT: control target
= control target key end

     0   :  { %7 = vsyncpa [#allocation3], 0  ;;  %s1292_s0 = inlined_call_operand.hbm [shape: f32[2,16,16,128], index: 0, kind: input, shape index: {}]   ;;  %s1293_s1 = inlined_call_operand.hbm [shape: f32[16,16,128], index: 1, kind: input, shape index: {}]   ;;  %s1294_s2 = inlined_call_operand.vmem [shape: f32[2,128,128], index: 2, kind: output, shape index: {}]  }
   0x1   :  { %9 = vsyncpa [#allocation3 + $0x1], 0 }
   0x2   :  { %10 = vsyncpa [#allocation5], 0  ;;  %s1113_s9 = smov 0   ;;  %s1115_s10 = smov 0  }
   0x3   :  { %s1117_s11 = smov 0   ;;  %s1119_s12 = smov 0  }
   0x4   :  { %s1121_s13 = smov 0   ;;  %s1123_s14 = smov 0  }
   0x5 LB: > { %s674_s15 = sadd.s32 4294967295, %s1092_s14   ;;  %p59_p0 = scmp.ne.s32.totalorder %s1076_s10, %s1072_s9  ;;  %s1092_s14 = sphi %s1123_s14, %s16_s14   ;;  %s1088_s13 = sphi %s1121_s13, %s1304_s13   ;;  %s1084_s12 = sphi %s1119_s12, %s1303_s12   ;;  %s1080_s11 = sphi %s1117_s11, %s1302_s11   ;;  %s1076_s10 = sphi %s1115_s10, %s1301_s10   ;;  %s1072_s9 = sphi %s1113_s9, %s1300_s9  }
   0x6   : > { %p1143_p1 = scmp.eq.s32.totalorder %s674_s15, 0  ;;  %p676_p2 = scmp.ge.s32.totalorder %s1092_s14, 1 }
   0x7   : > { %p124_p3 = scmp.lt.s32.totalorder %s1092_s14, 3  ;;  %s1094_s19 = smov [#allocation4]  }
   0x8   : > { %p1151_p4 = por %p1143_p1, %p59_p0  ;;  %s140_s20 = sshll.u32 %s1094_s19, 4  ;;  %s141_s20 = int_to_ptr.vmem [resolvable:$true] %s140_s20 }
   0x9   : > { %p1155_p5 = pnand %p676_p2, %p124_p3  ;;  %s35_s22 = sadd.s32 1, %s1088_s13 }
   0xa   : > { %s995_s23 = scalar_lea.vmem %s141_s20, 4096  ;;  %p1003_p12 = scmp.lt.s32.totalorder %s141_s20, %s141_s20 }
   0xb   : > { %p809_p6 = pneg %p1155_p5  ;;  %p996_p9 = scmp.ne.s32.totalorder %s141_s20, %s995_s23 }
   0xc   : > { %p1004_p13 = scmp.lt.s32.totalorder %s995_s23, %s995_s23 }
   0xd   : > { %p1163_p7 = pnand %p809_p6, %p1143_p1 }
   0xe   : > { %p1005_p0 = por %p1004_p13, %p1003_p12 }
   0xf   : > { %p986_p8 = pneg %p1163_p7 }
  0x11   : > { %p998_p10 = pnand %p996_p9, %p986_p8 }
  0x13   : > { %p999_p11 = pneg %p998_p10 }
  0x15   : > { %p1006_p2 = pnand %p1005_p0, %p999_p11 }
  0x17   : > { %1009 = shalt.err (!%p1006_p2)
}
  0x18   : > { %s1095_s24 = smov 128   ;;  %s1096_s25 = smov 8  }
  0x19   : > { %812 = dma.hbm_to_vmem [thread:$0]  (!%p1163_p7), %s1293_s1, 4096, %s141_s20, [#allocation5], %s1095_s24, %s1095_s24, %s1096_s25  }
  0x1a   : > { %p37_p3 = scmp.ge.s32.totalorder %s35_s22, 2  ;;  %s46_s28 = sadd.s32 1, %s1080_s11 }
  0x1b   : > { %p53_p6 = scmp.ne.s32.totalorder %s1080_s11, %s1076_s10  ;;  %p54_p8 = scmp.eq.s32.totalorder %s1092_s14, 0 }
  0x1c   : > { %s1306_s22 = smov (%p37_p3, %s35_s22), 0  ;;  %p818_p10 = scmp.lt.s32.totalorder %s1092_s14, 2 }
  0x1d   : > { %p55_p9 = por %p54_p8, %p53_p6  ;;  %s39_s29 = ssub.s32 %s1088_s13, %s1306_s22 }
  0x1e   : > { %s154_s30 = sand.u32 1, %s1080_s11   ;;  %p44_p11 = scmp.eq.s32.totalorder %s39_s29, 0 }
  0x1f   : > { %s679_s3 = sshll.u32 %s154_s30, 8  ;;  %s689_s4 = sshll.u32 %s1088_s13, 12 }
  0x20   : > { %s1190_s5 = scalar_select %p44_p11, %s1080_s11, %s46_s28  }
  0x21   : > { %s168_s8 = scalar_lea.hbm %s1292_s0, %s689_s4  ;;  %s158_s9 = scalar_lea.vmem [#allocation2], %s679_s3 }
  0x22   : > { %s169_s15 = sshll.u32 %s158_s9, 4  ;;  %p1195_p7 = pnand %p818_p10, %p55_p9  ;;  %s170_s15 = int_to_ptr.vmem [resolvable:$true] %s169_s15 }
  0x23   : > { %s155_s20 = scalar_lea.sflag [#allocation3], %s154_s30  ;;  %s1023_s21 = scalar_lea.vmem %s170_s15, 4096 }
  0x24   : > { %p1012_p12 = pneg %p1195_p7  ;;  %p1024_p13 = scmp.ne.s32.totalorder %s170_s15, %s1023_s21 }
  0x25   : > { %s1097_s23 = smov [#allocation2]  }
  0x26   : > { %p1026_p0 = pnand %p1024_p13, %p1012_p12  ;;  %s1028_s26 = sshll.u32 %s1097_s23, 4  ;;  %s1029_s26 = int_to_ptr.vmem [resolvable:$false] %s1028_s26 }
  0x27   : > { %s1030_s27 = scalar_lea.vmem %s1029_s26, 8192  ;;  %p1031_p3 = scmp.lt.s32.totalorder %s170_s15, %s1029_s26 }
  0x28   : > { %p1027_p2 = pneg %p1026_p0  ;;  %p1032_p6 = scmp.lt.s32.totalorder %s1030_s27, %s1023_s21 }
  0x2a   : > { %p1033_p8 = por %p1032_p6, %p1031_p3 }
  0x2c   : > { %p1034_p9 = pnand %p1033_p8, %p1027_p2 }
  0x2e   : > { %1037 = shalt.err (!%p1034_p9)
}
  0x2f   : > { %816 = dma.hbm_to_vmem [thread:$0]  (!%p1195_p7), %s168_s8, 4096, %s170_s15, %s155_s20, %s1095_s24, %s1095_s24, %s1096_s25  }
  0x30   : > { %181 = sbr.rel (%p1155_p5) target bundleno = 446 (0x1be), region = 28  ;;  %s183_s28 = sand.u32 (!%p1155_p5), 1, %s1076_s10  }
  0x31   : > { %s683_s29 = sshll.u32 (!%p1155_p5), %s183_s28, 8  ;;  %s184_s30 = scalar_lea.sflag (!%p1155_p5), [#allocation3], %s183_s28 }
  0x32   : > { %s1209_s3 = scalar_lea.vmem (!%p1155_p5), [#allocation2], %s683_s29 }
  0x35   : > { %1063 = dma.done.wait (%p1151_p4), %s184_s30, 4096  }
  0x36   : > { %1065 = vsyncadd (%p1151_p4), %s184_s30, 4294963200 }
  0x37   : > { %1067 = dma.done.wait (%p1143_p1), [#allocation5], 4096  }
  0x38   : > { %1069 = vsyncadd (%p1143_p1), [#allocation5], 4294963200  ;;  %v277_v0 = vld [vmem:[#allocation4] sm:$0xff]  ;;  %v278_v2 = vld [vmem:[#allocation4 + $0x8] sm:$0xff]  ;;  %p217_p1 = scmp.lt.s32.totalorder %s1084_s12, 1 }
  0x39   : > { %v293_v1 = vld [vmem:[#allocation4 + $0x80] sm:$0xff]  ;;  %v294_v4 = vld [vmem:[#allocation4 + $0x88] sm:$0xff]  ;;  %v279_v6 = vld [vmem:[#allocation4 + $0x10] sm:$0xff] }
  0x3a   : > { %v872_v3 = vpack.i.bf16 %v277_v0, %v293_v1  ;;  %v874_v5 = vpack.i.bf16 %v278_v2, %v294_v4  ;;  %v295_v7 = vld [vmem:[#allocation4 + $0x90] sm:$0xff]  ;;  %v280_v9 = vld [vmem:[#allocation4 + $0x18] sm:$0xff]  ;;  %v281_v16 = vld [vmem:[#allocation4 + $0x20] sm:$0xff]  ;;  %s1308_s12 = smov (!%p217_p1, %s1084_s12), 1 }
  0x3b   : > { %v876_v8 = vpack.i.bf16 %v279_v6, %v295_v7  ;;  %v296_v10 = vld [vmem:[#allocation4 + $0x98] sm:$0xff]  ;;  %v275_v14 = vld [vmem:[%s1209_s3 + $0xf0] sm:$0xff]  ;;  %v297_v17 = vld [vmem:[#allocation4 + $0xa0] sm:$0xff]  ;;  %s690_s16 = sshll.u32 %s1308_s12, 7 }
  0x3c   : > { %873 = vxpose.xlu0.b32.start [1/16] %v872_v3, 128  ;;  %v276_v11 = vld [vmem:[%s1209_s3 + $0xf8] sm:$0xff]  ;;  %v878_v12 = vpack.i.bf16 %v280_v9, %v296_v10  ;;  %v259_v15 = vld [vmem:[%s1209_s3 + $0x70] sm:$0xff]  ;;  %v274_v18 = vld [vmem:[%s1209_s3 + $0xe8] sm:$0xff]  ;;  %v880_v21 = vpack.i.bf16 %v281_v16, %v297_v17  ;;  %s1256_s24 = scalar_lea.vmem %s1294_s2, %s690_s16 }
  0x3d   : > { %691 = vmatprep.subr.mxu0 %v276_v11  ;;  %v260_v13 = vld [vmem:[%s1209_s3 + $0x78] sm:$0xff]  ;;  %771 = vmatprep.subr.mxu1 %v276_v11  ;;  %v258_v19 = vld [vmem:[%s1209_s3 + $0x68] sm:$0xff]  ;;  %v273_v20 = vld [vmem:[%s1209_s3 + $0xe0] sm:$0xff] }
  0x3e   : > { %692 = vmatpush3.msra.mxu0 %v260_v13  ;;  %787 = vmatpush3.msra.mxu1 %v260_v13  ;;  %v257_v22 = vld [vmem:[%s1209_s3 + $0x60] sm:$0xff]  ;;  %v282_v23 = vld [vmem:[#allocation4 + $0x28] sm:$0xff]  ;;  %v272_v25 = vld [vmem:[%s1209_s3 + $0xd8] sm:$0xff] }
  0x3f   : > { %693 = vmatprep.subr.mxu0 %v275_v14  ;;  %772 = vmatprep.subr.mxu1 %v275_v14  ;;  %v298_v24 = vld [vmem:[#allocation4 + $0xa8] sm:$0xff]  ;;  %v256_v26 = vld [vmem:[%s1209_s3 + $0x58] sm:$0xff]  ;;  %v271_v27 = vld [vmem:[%s1209_s3 + $0xd0] sm:$0xff] }
  0x40   : > { %875 = vxpose.xlu0.b32.cont [2/16] %v874_v5, 128  ;;  %694 = vmatpush3.msra.mxu0 %v259_v15  ;;  %v882_v28 = vpack.i.bf16 %v282_v23, %v298_v24  ;;  %v255_v29 = vld [vmem:[%s1209_s3 + $0x50] sm:$0xff]  ;;  %v270_v32 = vld [vmem:[%s1209_s3 + $0xc8] sm:$0xff]  ;;  %v269_v34 = vld [vmem:[%s1209_s3 + $0xc0] sm:$0xff] }
  0x41   : > { %695 = vmatprep.subr.mxu0 %v274_v18  ;;  %788 = vmatpush3.msra.mxu1 %v259_v15  ;;  %v283_v30 = vld [vmem:[#allocation4 + $0x30] sm:$0xff]  ;;  %v254_v33 = vld [vmem:[%s1209_s3 + $0x48] sm:$0xff]  ;;  %v253_v36 = vld [vmem:[%s1209_s3 + $0x40] sm:$0xff] }
  0x42   : > { %696 = vmatpush3.msra.mxu0 %v258_v19  ;;  %773 = vmatprep.subr.mxu1 %v274_v18  ;;  %v299_v31 = vld [vmem:[#allocation4 + $0xb0] sm:$0xff]  ;;  %v284_v37 = vld [vmem:[#allocation4 + $0x38] sm:$0xff]  ;;  %v285_v44 = vld [vmem:[#allocation4 + $0x40] sm:$0xff] }
  0x43   : > { %697 = vmatprep.subr.mxu0 %v273_v20  ;;  %789 = vmatpush3.msra.mxu1 %v258_v19  ;;  %v884_v35 = vpack.i.bf16 %v283_v30, %v299_v31  ;;  %v300_v38 = vld [vmem:[#allocation4 + $0xb8] sm:$0xff]  ;;  %v267_v41 = vld [vmem:[%s1209_s3 + $0xb0] sm:$0xff]  ;;  %v301_v45 = vld [vmem:[#allocation4 + $0xc0] sm:$0xff] }
  0x44   : > { %877 = vxpose.xlu0.b32.cont [3/16] %v876_v8, 128  ;;  %698 = vmatpush3.msra.mxu0 %v257_v22  ;;  %v268_v39 = vld [vmem:[%s1209_s3 + $0xb8] sm:$0xff]  ;;  %v886_v42 = vpack.i.bf16 %v284_v37, %v300_v38  ;;  %v251_v43 = vld [vmem:[%s1209_s3 + $0x30] sm:$0xff]  ;;  %v266_v46 = vld [vmem:[%s1209_s3 + $0xa8] sm:$0xff]  ;;  %v888_v49 = vpack.i.bf16 %v285_v44, %v301_v45 }
  0x45   : > { %699 = vmatprep.subr.mxu0 %v272_v25  ;;  %774 = vmatprep.subr.mxu1 %v273_v20  ;;  %v252_v40 = vld [vmem:[%s1209_s3 + $0x38] sm:$0xff]  ;;  %v250_v47 = vld [vmem:[%s1209_s3 + $0x28] sm:$0xff]  ;;  %v265_v48 = vld [vmem:[%s1209_s3 + $0xa0] sm:$0xff] }
  0x46   : > { %700 = vmatpush3.msra.mxu0 %v256_v26  ;;  %790 = vmatpush3.msra.mxu1 %v257_v22  ;;  %v249_v50 = vld [vmem:[%s1209_s3 + $0x20] sm:$0xff]  ;;  %v286_v51 = vld [vmem:[#allocation4 + $0x48] sm:$0xff]  ;;  %v264_v53 = vld [vmem:[%s1209_s3 + $0x98] sm:$0xff] }
  0x47   : > { %701 = vmatprep.subr.mxu0 %v271_v27  ;;  %775 = vmatprep.subr.mxu1 %v272_v25  ;;  %v302_v52 = vld [vmem:[#allocation4 + $0xc8] sm:$0xff]  ;;  %v248_v54 = vld [vmem:[%s1209_s3 + $0x18] sm:$0xff]  ;;  %v263_v55 = vld [vmem:[%s1209_s3 + $0x90] sm:$0xff] }
  0x48   : > { %879 = vxpose.xlu0.b32.cont [4/16] %v878_v12, 128  ;;  %702 = vmatpush3.msra.mxu0 %v255_v29  ;;  %v890_v56 = vpack.i.bf16 %v286_v51, %v302_v52  ;;  %v247_v57 = vld [vmem:[%s1209_s3 + $0x10] sm:$0xff]  ;;  %v262_v60 = vld [vmem:[%s1209_s3 + $0x88] sm:$0xff]  ;;  %v261_v62 = vld [vmem:[%s1209_s3 + $0x80] sm:$0xff] }
  0x49   : > { %703 = vmatprep.subr.mxu0 %v270_v32  ;;  %791 = vmatpush3.msra.mxu1 %v256_v26  ;;  %v287_v58 = vld [vmem:[#allocation4 + $0x50] sm:$0xff]  ;;  %v246_v61 = vld [vmem:[%s1209_s3 + $0x8] sm:$0xff]  ;;  %v245_v0 = vld [vmem:[%s1209_s3] sm:$0xff] }
  0x4a   : > { %704 = vmatpush3.msra.mxu0 %v254_v33  ;;  %776 = vmatprep.subr.mxu1 %v271_v27  ;;  %v303_v59 = vld [vmem:[#allocation4 + $0xd0] sm:$0xff]  ;;  %v288_v1 = vld [vmem:[#allocation4 + $0x58] sm:$0xff]  ;;  %v289_v4 = vld [vmem:[#allocation4 + $0x60] sm:$0xff] }
  0x4b   : > { %705 = vmatprep.subr.mxu0 %v269_v34  ;;  %792 = vmatpush3.msra.mxu1 %v255_v29  ;;  %v892_v63 = vpack.i.bf16 %v287_v58, %v303_v59  ;;  %v304_v2 = vld [vmem:[#allocation4 + $0xd8] sm:$0xff]  ;;  %v305_v5 = vld [vmem:[#allocation4 + $0xe0] sm:$0xff]  ;;  %v290_v7 = vld [vmem:[#allocation4 + $0x68] sm:$0xff] }
  0x4c   : > { %881 = vxpose.xlu0.b32.cont [5/16] %v880_v21, 128  ;;  %706 = vmatpush3.msra.mxu0 %v253_v36  ;;  %v894_v3 = vpack.i.bf16 %v288_v1, %v304_v2  ;;  %v896_v6 = vpack.i.bf16 %v289_v4, %v305_v5  ;;  %v306_v8 = vld [vmem:[#allocation4 + $0xe8] sm:$0xff]  ;;  %v291_v10 = vld [vmem:[#allocation4 + $0x70] sm:$0xff]  ;;  %v292_v13 = vld [vmem:[#allocation4 + $0x78] sm:$0xff] }
  0x4d   : > { %707 = vmatprep.subr.mxu0 %v268_v39  ;;  %777 = vmatprep.subr.mxu1 %v270_v32  ;;  %v898_v9 = vpack.i.bf16 %v290_v7, %v306_v8  ;;  %v307_v11 = vld [vmem:[#allocation4 + $0xf0] sm:$0xff]  ;;  %v308_v14 = vld [vmem:[#allocation4 + $0xf8] sm:$0xff] }
  0x4e   : > { %708 = vmatpush3.msra.mxu0 %v252_v40  ;;  %793 = vmatpush3.msra.mxu1 %v254_v33  ;;  %v900_v12 = vpack.i.bf16 %v291_v10, %v307_v11  ;;  %v902_v15 = vpack.i.bf16 %v292_v13, %v308_v14 }
  0x4f   : > { %709 = vmatprep.subr.mxu0 %v267_v41  ;;  %778 = vmatprep.subr.mxu1 %v269_v34 }
  0x50   : > { %883 = vxpose.xlu0.b32.cont [6/16] %v882_v28, 128  ;;  %710 = vmatpush3.msra.mxu0 %v251_v43 }
  0x51   : > { %711 = vmatprep.subr.mxu0 %v266_v46  ;;  %794 = vmatpush3.msra.mxu1 %v253_v36 }
  0x52   : > { %712 = vmatpush3.msra.mxu0 %v250_v47  ;;  %779 = vmatprep.subr.mxu1 %v268_v39 }
  0x53   : > { %713 = vmatprep.subr.mxu0 %v265_v48  ;;  %795 = vmatpush3.msra.mxu1 %v252_v40 }
  0x54   : > { %885 = vxpose.xlu0.b32.cont [7/16] %v884_v35, 128  ;;  %714 = vmatpush3.msra.mxu0 %v249_v50 }
  0x55   : > { %715 = vmatprep.subr.mxu0 %v264_v53  ;;  %780 = vmatprep.subr.mxu1 %v267_v41 }
  0x56   : > { %716 = vmatpush3.msra.mxu0 %v248_v54  ;;  %796 = vmatpush3.msra.mxu1 %v251_v43 }
  0x57   : > { %717 = vmatprep.subr.mxu0 %v263_v55  ;;  %781 = vmatprep.subr.mxu1 %v266_v46 }
  0x58   : > { %887 = vxpose.xlu0.b32.cont [8/16] %v886_v42, 128  ;;  %718 = vmatpush3.msra.mxu0 %v247_v57 }
  0x59   : > { %719 = vmatprep.subr.mxu0 %v262_v60  ;;  %797 = vmatpush3.msra.mxu1 %v250_v47 }
  0x5a   : > { %720 = vmatpush3.msra.mxu0 %v246_v61  ;;  %782 = vmatprep.subr.mxu1 %v265_v48 }
  0x5b   : > { %721 = vmatprep.subr.mxu0 %v261_v62  ;;  %798 = vmatpush3.msra.mxu1 %v249_v50 }
  0x5c   : > { %889 = vxpose.xlu0.b32.cont [9/16] %v888_v49, 128  ;;  %722 = vmatpush3.msra.mxu0 %v245_v0 }
  0x5d   : > { %783 = vmatprep.subr.mxu1 %v264_v53 }
  0x5e   : > { %799 = vmatpush3.msra.mxu1 %v248_v54 }
  0x5f   : > { %784 = vmatprep.subr.mxu1 %v263_v55 }
  0x60   : > { %891 = vxpose.xlu0.b32.cont [10/16] %v890_v56, 128  ;;  %800 = vmatpush3.msra.mxu1 %v247_v57 }
  0x61   : > { %785 = vmatprep.subr.mxu1 %v262_v60 }
  0x62   : > { %801 = vmatpush3.msra.mxu1 %v246_v61 }
  0x63   : > { %786 = vmatprep.subr.mxu1 %v261_v62 }
  0x64   : > { %893 = vxpose.xlu0.b32.cont [11/16] %v892_v63, 128  ;;  %802 = vmatpush3.msra.mxu1 %v245_v0 }
  0x68   : > { %895 = vxpose.xlu0.b32.cont [12/16] %v894_v3, 128 }
  0x6c   : > { %897 = vxpose.xlu0.b32.cont [13/16] %v896_v6, 128 }
  0x70   : > { %899 = vxpose.xlu0.b32.cont [14/16] %v898_v9, 128 }
  0x74   : > { %901 = vxpose.xlu0.b32.cont [15/16] %v900_v12, 128 }
  0x78   : > { %903 = vxpose.xlu0.b32.end [16/16] %v902_v15, 128 }
  0xb8   : > { %v904_v16 = vpop.trf.xlu0 }
  0xb9   : > { %v905_v17 = vunpack.i.l.bf16 %v904_v16  ;;  %v908_v18 = vunpack.i.h.bf16 %v904_v16 }
  0xbb   : > { %453 = vmatprep.mubr.f32.mxu0 %v905_v17 }
  0xbc   : > { %v909_v19 = vpop.trf.xlu0  ;;  %454 = vmatmul.mubr.f32.vlgmr.msra.gmra.mxu0 %v908_v18 }
  0xbd   : > { %v910_v20 = vunpack.i.l.bf16 %v909_v19  ;;  %v913_v21 = vunpack.i.h.bf16 %v909_v19 }
  0xbf   : > { %458 = vmatprep.mubr.f32.mxu0 %v910_v20 }
  0xc0   : > { %v914_v22 = vpop.trf.xlu0  ;;  %459 = vmatmul.mubr.f32.gmra.mxu0 %v913_v21 }
  0xc1   : > { %v915_v23 = vunpack.i.l.bf16 %v914_v22  ;;  %v918_v24 = vunpack.i.h.bf16 %v914_v22 }
  0xc3   : > { %463 = vmatprep.mubr.f32.mxu0 %v915_v23 }
  0xc4   : > { %v919_v25 = vpop.trf.xlu0  ;;  %464 = vmatmul.mubr.f32.gmra.mxu0 %v918_v24 }
  0xc5   : > { %v920_v26 = vunpack.i.l.bf16 %v919_v25  ;;  %v923_v27 = vunpack.i.h.bf16 %v919_v25 }
  0xc7   : > { %468 = vmatprep.mubr.f32.mxu0 %v920_v26 }
  0xc8   : > { %v924_v28 = vpop.trf.xlu0  ;;  %469 = vmatmul.mubr.f32.gmra.mxu0 %v923_v27 }
  0xc9   : > { %v925_v29 = vunpack.i.l.bf16 %v924_v28  ;;  %v928_v30 = vunpack.i.h.bf16 %v924_v28 }
  0xcb   : > { %473 = vmatprep.mubr.f32.mxu0 %v925_v29 }
  0xcc   : > { %v929_v31 = vpop.trf.xlu0  ;;  %474 = vmatmul.mubr.f32.gmra.mxu0 %v928_v30 }
  0xcd   : > { %v930_v32 = vunpack.i.l.bf16 %v929_v31  ;;  %v933_v33 = vunpack.i.h.bf16 %v929_v31 }
  0xcf   : > { %478 = vmatprep.mubr.f32.mxu0 %v930_v32 }
  0xd0   : > { %v934_v34 = vpop.trf.xlu0  ;;  %479 = vmatmul.mubr.f32.gmra.mxu0 %v933_v33 }
  0xd1   : > { %v935_v35 = vunpack.i.l.bf16 %v934_v34  ;;  %v938_v36 = vunpack.i.h.bf16 %v934_v34 }
  0xd3   : > { %483 = vmatprep.mubr.f32.mxu0 %v935_v35 }
  0xd4   : > { %v939_v37 = vpop.trf.xlu0  ;;  %484 = vmatmul.mubr.f32.gmra.mxu0 %v938_v36 }
  0xd5   : > { %v940_v38 = vunpack.i.l.bf16 %v939_v37  ;;  %v943_v39 = vunpack.i.h.bf16 %v939_v37 }
  0xd7   : > { %488 = vmatprep.mubr.f32.mxu0 %v940_v38 }
  0xd8   : > { %v944_v40 = vpop.trf.xlu0  ;;  %489 = vmatmul.mubr.f32.gmra.mxu0 %v943_v39 }
  0xd9   : > { %v945_v41 = vunpack.i.l.bf16 %v944_v40  ;;  %v948_v42 = vunpack.i.h.bf16 %v944_v40 }
  0xdb   : > { %493 = vmatprep.mubr.f32.mxu1 %v945_v41 }
  0xdc   : > { %v949_v43 = vpop.trf.xlu0  ;;  %494 = vmatmul.mubr.f32.vlgmr.msra.gmra.mxu1 %v948_v42 }
  0xdd   : > { %v950_v44 = vunpack.i.l.bf16 %v949_v43  ;;  %v953_v45 = vunpack.i.h.bf16 %v949_v43 }
  0xdf   : > { %498 = vmatprep.mubr.f32.mxu1 %v950_v44 }
  0xe0   : > { %v954_v46 = vpop.trf.xlu0  ;;  %499 = vmatmul.mubr.f32.gmra.mxu1 %v953_v45 }
  0xe1   : > { %v955_v47 = vunpack.i.l.bf16 %v954_v46  ;;  %v958_v48 = vunpack.i.h.bf16 %v954_v46 }
  0xe3   : > { %503 = vmatprep.mubr.f32.mxu1 %v955_v47 }
  0xe4   : > { %v959_v49 = vpop.trf.xlu0  ;;  %504 = vmatmul.mubr.f32.gmra.mxu1 %v958_v48 }
  0xe5   : > { %v960_v50 = vunpack.i.l.bf16 %v959_v49  ;;  %v963_v51 = vunpack.i.h.bf16 %v959_v49 }
  0xe7   : > { %508 = vmatprep.mubr.f32.mxu1 %v960_v50 }
  0xe8   : > { %v964_v52 = vpop.trf.xlu0  ;;  %509 = vmatmul.mubr.f32.gmra.mxu1 %v963_v51 }
  0xe9   : > { %v965_v53 = vunpack.i.l.bf16 %v964_v52  ;;  %v968_v54 = vunpack.i.h.bf16 %v964_v52 }
  0xeb   : > { %513 = vmatprep.mubr.f32.mxu1 %v965_v53 }
  0xec   : > { %v969_v55 = vpop.trf.xlu0  ;;  %514 = vmatmul.mubr.f32.gmra.mxu1 %v968_v54 }
  0xed   : > { %v970_v56 = vunpack.i.l.bf16 %v969_v55  ;;  %v973_v57 = vunpack.i.h.bf16 %v969_v55 }
  0xef   : > { %518 = vmatprep.mubr.f32.mxu1 %v970_v56 }
  0xf0   : > { %v974_v58 = vpop.trf.xlu0  ;;  %519 = vmatmul.mubr.f32.gmra.mxu1 %v973_v57 }
  0xf1   : > { %v975_v59 = vunpack.i.l.bf16 %v974_v58  ;;  %v978_v60 = vunpack.i.h.bf16 %v974_v58 }
  0xf3   : > { %523 = vmatprep.mubr.f32.mxu1 %v975_v59 }
  0xf4   : > { %v979_v61 = vpop.trf.xlu0  ;;  %524 = vmatmul.mubr.f32.gmra.mxu1 %v978_v60 }
  0xf5   : > { %v983_v62 = vunpack.i.h.bf16 %v979_v61  ;;  %v980_v63 = vunpack.i.l.bf16 %v979_v61 }
  0xf7   : > { %528 = vmatprep.mubr.f32.mxu1 %v980_v63 }
  0xf8   : > { %529 = vmatmul.mubr.f32.gmra.mxu1 %v983_v62 }
 0x17c   : > { %v723_v0 = vpop.f32.mrf.mxu0 }
 0x17e   : > { %v724_v1 = vpop.f32.mrf.mxu0 }
 0x17f   : > { %v725_v2 = vadd.f32 %v724_v1, %v723_v0 }
 0x180   : > { %v726_v3 = vpop.f32.mrf.mxu0 }
 0x181   : > { %550 = vst [vmem:[%s1256_s24] sm:$0xff] %v725_v2 }
 0x182   : > { %v727_v4 = vpop.f32.mrf.mxu0 }
 0x183   : > { %v728_v5 = vadd.f32 %v727_v4, %v726_v3 }
 0x184   : > { %v729_v6 = vpop.f32.mrf.mxu0 }
 0x185   : > { %551 = vst [vmem:[%s1256_s24 + $0x8] sm:$0xff] %v728_v5 }
 0x186   : > { %v730_v7 = vpop.f32.mrf.mxu0 }
 0x187   : > { %v731_v8 = vadd.f32 %v730_v7, %v729_v6 }
 0x188   : > { %v732_v9 = vpop.f32.mrf.mxu0 }
 0x189   : > { %552 = vst [vmem:[%s1256_s24 + $0x10] sm:$0xff] %v731_v8 }
 0x18a   : > { %v733_v10 = vpop.f32.mrf.mxu0 }
 0x18b   : > { %v734_v11 = vadd.f32 %v733_v10, %v732_v9 }
 0x18c   : > { %v735_v12 = vpop.f32.mrf.mxu0 }
 0x18d   : > { %553 = vst [vmem:[%s1256_s24 + $0x18] sm:$0xff] %v734_v11 }
 0x18e   : > { %v736_v13 = vpop.f32.mrf.mxu0 }
 0x18f   : > { %v737_v14 = vadd.f32 %v736_v13, %v735_v12 }
 0x190   : > { %v738_v15 = vpop.f32.mrf.mxu0 }
 0x191   : > { %554 = vst [vmem:[%s1256_s24 + $0x20] sm:$0xff] %v737_v14 }
 0x192   : > { %v739_v16 = vpop.f32.mrf.mxu0 }
 0x193   : > { %v740_v17 = vadd.f32 %v739_v16, %v738_v15 }
 0x194   : > { %v741_v18 = vpop.f32.mrf.mxu0 }
 0x195   : > { %555 = vst [vmem:[%s1256_s24 + $0x28] sm:$0xff] %v740_v17 }
 0x196   : > { %v742_v19 = vpop.f32.mrf.mxu0 }
 0x197   : > { %v743_v20 = vadd.f32 %v742_v19, %v741_v18 }
 0x198   : > { %v744_v21 = vpop.f32.mrf.mxu0 }
 0x199   : > { %556 = vst [vmem:[%s1256_s24 + $0x30] sm:$0xff] %v743_v20 }
 0x19a   : > { %v745_v22 = vpop.f32.mrf.mxu0 }
 0x19b   : > { %v746_v23 = vadd.f32 %v745_v22, %v744_v21 }
 0x19c   : > { %v747_v24 = vpop.f32.mrf.mxu1 }
 0x19d   : > { %557 = vst [vmem:[%s1256_s24 + $0x38] sm:$0xff] %v746_v23 }
 0x19e   : > { %v748_v25 = vpop.f32.mrf.mxu1 }
 0x19f   : > { %v749_v26 = vadd.f32 %v748_v25, %v747_v24 }
 0x1a0   : > { %v750_v27 = vpop.f32.mrf.mxu1 }
 0x1a1   : > { %558 = vst [vmem:[%s1256_s24 + $0x40] sm:$0xff] %v749_v26 }
 0x1a2   : > { %v751_v28 = vpop.f32.mrf.mxu1 }
 0x1a3   : > { %v752_v29 = vadd.f32 %v751_v28, %v750_v27 }
 0x1a4   : > { %v753_v30 = vpop.f32.mrf.mxu1 }
 0x1a5   : > { %559 = vst [vmem:[%s1256_s24 + $0x48] sm:$0xff] %v752_v29 }
 0x1a6   : > { %v754_v31 = vpop.f32.mrf.mxu1 }
 0x1a7   : > { %v755_v32 = vadd.f32 %v754_v31, %v753_v30 }
 0x1a8   : > { %v756_v33 = vpop.f32.mrf.mxu1 }
 0x1a9   : > { %560 = vst [vmem:[%s1256_s24 + $0x50] sm:$0xff] %v755_v32 }
 0x1aa   : > { %v757_v34 = vpop.f32.mrf.mxu1 }
 0x1ab   : > { %v758_v35 = vadd.f32 %v757_v34, %v756_v33 }
 0x1ac   : > { %v759_v36 = vpop.f32.mrf.mxu1 }
 0x1ad   : > { %561 = vst [vmem:[%s1256_s24 + $0x58] sm:$0xff] %v758_v35 }
 0x1ae   : > { %v760_v37 = vpop.f32.mrf.mxu1 }
 0x1af   : > { %v761_v38 = vadd.f32 %v760_v37, %v759_v36 }
 0x1b0   : > { %v762_v39 = vpop.f32.mrf.mxu1 }
 0x1b1   : > { %562 = vst [vmem:[%s1256_s24 + $0x60] sm:$0xff] %v761_v38 }
 0x1b2   : > { %v763_v40 = vpop.f32.mrf.mxu1 }
 0x1b3   : > { %v764_v41 = vadd.f32 %v763_v40, %v762_v39 }
 0x1b4   : > { %v765_v42 = vpop.f32.mrf.mxu1 }
 0x1b5   : > { %563 = vst [vmem:[%s1256_s24 + $0x68] sm:$0xff] %v764_v41 }
 0x1b6   : > { %v766_v43 = vpop.f32.mrf.mxu1 }
 0x1b7   : > { %v767_v44 = vadd.f32 %v766_v43, %v765_v42 }
 0x1b8   : > { %v768_v45 = vpop.f32.mrf.mxu1 }
 0x1b9   : > { %564 = vst [vmem:[%s1256_s24 + $0x70] sm:$0xff] %v767_v44 }
 0x1ba   : > { %v769_v46 = vpop.f32.mrf.mxu1 }
 0x1bb   : > { %v770_v47 = vadd.f32 %v769_v46, %v768_v45 }
 0x1bd   : > { %565 = vst [vmem:[%s1256_s24 + $0x78] sm:$0xff] %v770_v47 }
 0x1be PF: > { %s16_s14 = sadd.s32 1, %s1092_s14   ;;  %s1300_s9 = smov %s1076_s10 }
 0x1bf   : > { %p13_p4 = scmp.ge.s32.totalorder %s16_s14, 4   ;;  %s1301_s10 = smov %s1080_s11 }
 0x1c0   : > { %s1302_s11 = smov %s1190_s5  ;;  %s1303_s12 = smov %s1088_s13 }
 0x1c1   : > { %s1304_s13 = smov %s1306_s22  ;;  %15 = sbr.rel (!%p13_p4) target bundleno = 5 (0x5), region = 77 }
 0x1c6   :  { %593 = vsyncpa [#allocation3], 1 }
 0x1c7   :  { %595 = vsyncpa [#allocation3 + $0x1], 1 }
 0x1c8   :  { %596 = vsyncpa [#allocation5], 1 }

</bundles_post_ra>
